<compile_context>
chip_gen: v6e
topology: v6e:2x2x1
jax: 0.10.0
libtpu: 0.0.40
codegen_flags: <defaults>
</compile_context>

<pallas_src>
import jax
import jax.numpy as jnp
from jax.experimental import pallas as pl
from jax.experimental.pallas import tpu as pltpu


# ---------------------------------------------------------------------------
# Fused kernel: encoder (1x1 conv + ReLU) + AdaptiveConcatPool2d + gated
# attention MIL + classifier.  Grid = (bs, n); one instance per grid step.
# ---------------------------------------------------------------------------
def amil_kernel(x_ref, w_enc_ref, b_enc_ref,
                wv_ref, bv_ref, wu_ref, bu_ref, ww_ref, bw_ref,
                wc_ref, bc_ref,
                out_ref, pooled_sc):
    """x_ref: (1,1,C,P) one instance (channels-first, P=w*h on lanes);
    w_enc/b_enc: (NC,C)/(NC,1); wv,bv & wu,bu: (2NC,D)/(1,D); ww,bw: (D,1)/(1,1);
    wc,bc: (2NC,K)/(1,K); out_ref: (1,1,K); pooled_sc: VMEM (n, 2NC)."""
    i = pl.program_id(1)
    n = pl.num_programs(1)
    nc = w_enc_ref.shape[0]

    # ---- encoder stand-in: 1x1 conv + ReLU on a lane-dense (C, P) block ----
    # K = C is tiny (3): do the contraction as C VPU broadcast-FMAs, not MXU.
    x = x_ref[0, 0]                                     # (C, P)
    w = w_enc_ref[...]                                  # (NC, C)
    feat = w[:, 0:1] * x[0:1, :]
    for c in range(1, x.shape[0]):
        feat = feat + w[:, c:c + 1] * x[c:c + 1, :]
    feat = jnp.maximum(feat + b_enc_ref[...], 0.0)      # (NC, P)

    # ---- AdaptiveConcatPool2d + Flatten: [max | avg] over pixels (lane reduce) ----
    pooled_sc[pl.ds(i, 1), 0:nc] = jnp.max(feat, axis=1).reshape(1, nc)
    pooled_sc[pl.ds(i, 1), nc:2 * nc] = jnp.mean(feat, axis=1).reshape(1, nc)

    # ---- last instance of this bag: gated attention + weighted sum + classifier ----
    @pl.when(i == n - 1)
    def _():
        pooled = pooled_sc[...]                         # (n, 2NC)
        a_v = jnp.tanh(
            jnp.dot(pooled, wv_ref[...], preferred_element_type=jnp.float32)
            + bv_ref[...])
        a_u = jax.nn.sigmoid(
            jnp.dot(pooled, wu_ref[...], preferred_element_type=jnp.float32)
            + bu_ref[...])
        logits = (jnp.dot(a_v * a_u, ww_ref[...], preferred_element_type=jnp.float32)
                  + bw_ref[...])                        # (n, 1)
        logits = logits - jnp.max(logits, axis=0, keepdims=True)
        e = jnp.exp(logits)
        attn = e * pl.reciprocal(jnp.sum(e, axis=0, keepdims=True), approx=True)
        # torch.matmul(1 + a, x): attention-weighted sum over instances.
        bag = jnp.sum((1.0 + attn) * pooled, axis=0, keepdims=True)    # (1, 2NC)
        out_ref[0] = (jnp.dot(bag, wc_ref[...], preferred_element_type=jnp.float32)
                      + bc_ref[...])                    # (1, K)


# ---------------------------------------------------------------------------
# Glue: full AttentionMILModel forward (single pallas_call)
# ---------------------------------------------------------------------------
def attention_mil_forward(params, x):
    bs, n, ch, w, h = x.shape
    P = w * h
    nc = params["w_enc"].shape[0]
    num_classes = params["wc"].shape[1]
    # Contiguous reshape only (no transpose): pixels land on the 128-lane axis.
    x_pix = x.reshape(bs, n, ch, P).astype(jnp.float32)

    def full2d(a):
        return pl.BlockSpec(a.shape, lambda b, i: (0, 0))

    out = pl.pallas_call(
        amil_kernel,
        out_shape=jax.ShapeDtypeStruct((bs, 1, num_classes), jnp.float32),
        grid=(bs, n),
        in_specs=[
            pl.BlockSpec((1, 1, ch, P), lambda b, i: (b, i, 0, 0)),
            full2d(params["w_enc"]), full2d(params["b_enc"]),
            full2d(params["wv"]), full2d(params["bv"]),
            full2d(params["wu"]), full2d(params["bu"]),
            full2d(params["ww"]), full2d(params["bw"]),
            full2d(params["wc"]), full2d(params["bc"]),
        ],
        out_specs=pl.BlockSpec((1, 1, num_classes), lambda b, i: (b, 0, 0)),
        scratch_shapes=[pltpu.VMEM((n, 2 * nc), jnp.float32)],
        compiler_params=pltpu.CompilerParams(
            dimension_semantics=("parallel", "arbitrary"),
            vmem_limit_bytes=32 * 1024 * 1024),
    )(x_pix, params["w_enc"], params["b_enc"],
      params["wv"], params["bv"], params["wu"], params["bu"],
      params["ww"], params["bw"], params["wc"], params["bc"])

    out = out.reshape(bs, num_classes)
    return out, out                                     # reference returns (x, x)


# ---------------------------------------------------------------------------
# Deterministic parameter initialization (shapes from AttentionMILModel.__init__)
# ---------------------------------------------------------------------------
def init_params(key, in_channels=3, nc=32, attn_hidden=128, num_classes=2):
    ks = jax.random.split(key, 5)

    def lin(k, fan_in, fan_out):
        kw, kb = jax.random.split(k)
        lim = 1.0 / jnp.sqrt(float(fan_in))
        w = jax.random.uniform(kw, (fan_in, fan_out), jnp.float32, -lim, lim)
        b = jax.random.uniform(kb, (1, fan_out), jnp.float32, -lim, lim)
        return w, b

    p = {}
    w_e, b_e = lin(ks[0], in_channels, nc)              # synthetic frozen encoder
    p["w_enc"] = w_e.T                                  # (nc, ch)   (NC,C)@(C,P) orientation
    p["b_enc"] = b_e.T                                  # (nc, 1)
    p["wv"], p["bv"] = lin(ks[1], 2 * nc, attn_hidden)  # attention tanh branch
    p["wu"], p["bu"] = lin(ks[2], 2 * nc, attn_hidden)  # attention sigmoid (gate) branch
    p["ww"], p["bw"] = lin(ks[3], attn_hidden, 1)       # attention logits (1 attention class)
    p["wc"], p["bc"] = lin(ks[4], 2 * nc, num_classes)  # classifier Linear(2*nc, num_classes)
    return p


if __name__ == "__main__":
    key = jax.random.PRNGKey(0)
    kx, kp = jax.random.split(key)

    bs, n, ch, w, h = 2, 3, 3, 16, 16                   # num_instances = 3 (module default)
    num_classes = 2
    nc = 32

    x = jax.random.normal(kx, (bs, n, ch, w, h), jnp.float32)
    params = init_params(kp, in_channels=ch, nc=nc, num_classes=num_classes)

    out1, out2 = jax.jit(attention_mil_forward)(params, x)
    jax.block_until_ready((out1, out2))

    assert out1.shape == (bs, num_classes), out1.shape
    assert out2.shape == (bs, num_classes), out2.shape
    assert jnp.all(jnp.isfinite(out1)) and jnp.all(jnp.isfinite(out2))
    print("KERNEL_OK")
</pallas_src>

<mosaic_0001>
module attributes {stable_mosaic.version = 11 : i64} {
  func.func @amil_kernel(%arg0: i32, %arg1: i32, %arg2: memref<1x1x3x256xf32, #tpu.memory_space<vmem>>, %arg3: memref<32x3xf32, #tpu.memory_space<vmem>>, %arg4: memref<32x1xf32, #tpu.memory_space<vmem>>, %arg5: memref<64x128xf32, #tpu.memory_space<vmem>>, %arg6: memref<1x128xf32, #tpu.memory_space<vmem>>, %arg7: memref<64x128xf32, #tpu.memory_space<vmem>>, %arg8: memref<1x128xf32, #tpu.memory_space<vmem>>, %arg9: memref<128x1xf32, #tpu.memory_space<vmem>>, %arg10: memref<1x1xf32, #tpu.memory_space<vmem>>, %arg11: memref<64x2xf32, #tpu.memory_space<vmem>>, %arg12: memref<1x2xf32, #tpu.memory_space<vmem>>, %arg13: memref<1x1x2xf32, #tpu.memory_space<vmem>>, %arg14: memref<3x64xf32, #tpu.memory_space<vmem>>) attributes {dimension_semantics = [#tpu.dimension_semantics<parallel>, #tpu.dimension_semantics<arbitrary>], iteration_bounds = array<i64: 2, 3>, scalar_prefetch = 0 : i64, scratch_operands = 1 : i64, tpu.core_type = #tpu.core_type<tc>, window_params = [{transform_indices = @transform_0, window_bounds = array<i64: 1, 1, 3, 256>}, {pipeline_mode = #tpu.pipeline_mode<synchronous>, transform_indices = @transform_1, window_bounds = array<i64: 32, 3>}, {pipeline_mode = #tpu.pipeline_mode<synchronous>, transform_indices = @transform_2, window_bounds = array<i64: 32, 1>}, {pipeline_mode = #tpu.pipeline_mode<synchronous>, transform_indices = @transform_3, window_bounds = array<i64: 64, 128>}, {pipeline_mode = #tpu.pipeline_mode<synchronous>, transform_indices = @transform_4, window_bounds = array<i64: 1, 128>}, {pipeline_mode = #tpu.pipeline_mode<synchronous>, transform_indices = @transform_5, window_bounds = array<i64: 64, 128>}, {pipeline_mode = #tpu.pipeline_mode<synchronous>, transform_indices = @transform_6, window_bounds = array<i64: 1, 128>}, {pipeline_mode = #tpu.pipeline_mode<synchronous>, transform_indices = @transform_7, window_bounds = array<i64: 128, 1>}, {pipeline_mode = #tpu.pipeline_mode<synchronous>, transform_indices = @transform_8, window_bounds = array<i64: 1, 1>}, {pipeline_mode = #tpu.pipeline_mode<synchronous>, transform_indices = @transform_9, window_bounds = array<i64: 64, 2>}, {pipeline_mode = #tpu.pipeline_mode<synchronous>, transform_indices = @transform_10, window_bounds = array<i64: 1, 2>}, {transform_indices = @transform_11, window_bounds = array<i64: 1, 1, 2>}]} {
    %c0 = arith.constant 0 : index
    %c0_0 = arith.constant 0 : index
    %c0_1 = arith.constant 0 : index
    %c0_2 = arith.constant 0 : index
    %0 = vector.load %arg2[%c0, %c0_0, %c0_1, %c0_2] : memref<1x1x3x256xf32, #tpu.memory_space<vmem>>, vector<1x1x3x256xf32>
    %1 = vector.shape_cast %0 : vector<1x1x3x256xf32> to vector<3x256xf32>
    %c0_3 = arith.constant 0 : index
    %c0_4 = arith.constant 0 : index
    %2 = vector.load %arg3[%c0_3, %c0_4] : memref<32x3xf32, #tpu.memory_space<vmem>>, vector<32x3xf32>
    %3 = vector.extract_strided_slice %2 {offsets = [0, 0], sizes = [32, 1], strides = [1, 1]} : vector<32x3xf32> to vector<32x1xf32>
    %4 = vector.extract_strided_slice %1 {offsets = [0, 0], sizes = [1, 256], strides = [1, 1]} : vector<3x256xf32> to vector<1x256xf32>
    %5 = vector.broadcast %3 : vector<32x1xf32> to vector<32x256xf32>
    %6 = vector.broadcast %4 : vector<1x256xf32> to vector<32x256xf32>
    %7 = arith.mulf %5, %6 : vector<32x256xf32>
    %8 = vector.extract_strided_slice %2 {offsets = [0, 1], sizes = [32, 1], strides = [1, 1]} : vector<32x3xf32> to vector<32x1xf32>
    %9 = vector.extract_strided_slice %1 {offsets = [1, 0], sizes = [1, 256], strides = [1, 1]} : vector<3x256xf32> to vector<1x256xf32>
    %10 = vector.broadcast %8 : vector<32x1xf32> to vector<32x256xf32>
    %11 = vector.broadcast %9 : vector<1x256xf32> to vector<32x256xf32>
    %12 = arith.mulf %10, %11 : vector<32x256xf32>
    %13 = arith.addf %7, %12 : vector<32x256xf32>
    %14 = vector.extract_strided_slice %2 {offsets = [0, 2], sizes = [32, 1], strides = [1, 1]} : vector<32x3xf32> to vector<32x1xf32>
    %15 = vector.extract_strided_slice %1 {offsets = [2, 0], sizes = [1, 256], strides = [1, 1]} : vector<3x256xf32> to vector<1x256xf32>
    %16 = vector.broadcast %14 : vector<32x1xf32> to vector<32x256xf32>
    %17 = vector.broadcast %15 : vector<1x256xf32> to vector<32x256xf32>
    %18 = arith.mulf %16, %17 : vector<32x256xf32>
    %19 = arith.addf %13, %18 : vector<32x256xf32>
    %c0_5 = arith.constant 0 : index
    %c0_6 = arith.constant 0 : index
    %20 = vector.load %arg4[%c0_5, %c0_6] : memref<32x1xf32, #tpu.memory_space<vmem>>, vector<32x1xf32>
    %21 = vector.broadcast %20 : vector<32x1xf32> to vector<32x256xf32>
    %22 = arith.addf %19, %21 : vector<32x256xf32>
    %cst = arith.constant 0.000000e+00 : f32
    %23 = vector.broadcast %cst : f32 to vector<32x256xf32>
    %24 = arith.maximumf %22, %23 : vector<32x256xf32>
    %cst_7 = arith.constant dense<0xFF800000> : vector<32xf32>
    %25 = vector.multi_reduction <maximumf>, %24, %cst_7 [1] : vector<32x256xf32> to vector<32xf32>
    %26 = vector.shape_cast %25 : vector<32xf32> to vector<1x32xf32>
    %27 = arith.index_cast %arg1 : i32 to index
    %c0_8 = arith.constant 0 : index
    %28 = vector.load %arg14[%27, %c0_8] : memref<3x64xf32, #tpu.memory_space<vmem>>, vector<1x32xf32>
    tpu.vector_store %arg14[%27, %c0_8], %26 {strides = array<i32>} : memref<3x64xf32, #tpu.memory_space<vmem>>, vector<1x32xf32>,
    %cst_9 = arith.constant dense<0.000000e+00> : vector<32xf32>
    %29 = vector.multi_reduction <add>, %24, %cst_9 [1] : vector<32x256xf32> to vector<32xf32>
    %cst_10 = arith.constant 2.560000e+02 : f32
    %30 = vector.broadcast %cst_10 : f32 to vector<32xf32>
    %31 = arith.divf %29, %30 : vector<32xf32>
    %32 = vector.shape_cast %31 : vector<32xf32> to vector<1x32xf32>
    %33 = arith.index_cast %arg1 : i32 to index
    %c32 = arith.constant 32 : index
    %34 = vector.load %arg14[%33, %c32] : memref<3x64xf32, #tpu.memory_space<vmem>>, vector<1x32xf32>
    tpu.vector_store %arg14[%33, %c32], %32 {strides = array<i32>} : memref<3x64xf32, #tpu.memory_space<vmem>>, vector<1x32xf32>,
    %c2_i32 = arith.constant 2 : i32
    %35 = arith.cmpi eq, %arg1, %c2_i32 : i32
    %36 = arith.extui %35 : i1 to i32
    %c0_i32 = arith.constant 0 : i32
    %37 = arith.cmpi ne, %36, %c0_i32 : i32
    scf.if %37 {
      %c0_11 = arith.constant 0 : index
      %c0_12 = arith.constant 0 : index
      %38 = vector.load %arg14[%c0_11, %c0_12] : memref<3x64xf32, #tpu.memory_space<vmem>>, vector<3x64xf32>
      %c0_13 = arith.constant 0 : index
      %c0_14 = arith.constant 0 : index
      %39 = vector.load %arg5[%c0_13, %c0_14] : memref<64x128xf32, #tpu.memory_space<vmem>>, vector<64x128xf32>
      %cst_15 = arith.constant dense<0.000000e+00> : vector<3x128xf32>
      %40 = tpu.matmul %38, %39, %cst_15 {dimension_numbers = #tpu.dot_dimension_numbers<[1], [0], [0], [1], [0, 0, 1, 1], [], []>} : vector<3x64xf32>, vector<64x128xf32>, vector<3x128xf32> -> vector<3x128xf32>
      %c0_16 = arith.constant 0 : index
      %c0_17 = arith.constant 0 : index
      %41 = vector.load %arg6[%c0_16, %c0_17] : memref<1x128xf32, #tpu.memory_space<vmem>>, vector<1x128xf32>
      %42 = vector.broadcast %41 : vector<1x128xf32> to vector<3x128xf32>
      %43 = arith.addf %40, %42 : vector<3x128xf32>
      %44 = math.tanh %43 : vector<3x128xf32>
      %c0_18 = arith.constant 0 : index
      %c0_19 = arith.constant 0 : index
      %45 = vector.load %arg7[%c0_18, %c0_19] : memref<64x128xf32, #tpu.memory_space<vmem>>, vector<64x128xf32>
      %cst_20 = arith.constant dense<0.000000e+00> : vector<3x128xf32>
      %46 = tpu.matmul %38, %45, %cst_20 {dimension_numbers = #tpu.dot_dimension_numbers<[1], [0], [0], [1], [0, 0, 1, 1], [], []>} : vector<3x64xf32>, vector<64x128xf32>, vector<3x128xf32> -> vector<3x128xf32>
      %c0_21 = arith.constant 0 : index
      %c0_22 = arith.constant 0 : index
      %47 = vector.load %arg8[%c0_21, %c0_22] : memref<1x128xf32, #tpu.memory_space<vmem>>, vector<1x128xf32>
      %48 = vector.broadcast %47 : vector<1x128xf32> to vector<3x128xf32>
      %49 = arith.addf %46, %48 : vector<3x128xf32>
      %50 = arith.negf %49 : vector<3x128xf32>
      %51 = math.exp %50 : vector<3x128xf32>
      %cst_23 = arith.constant 1.000000e+00 : f32
      %52 = vector.broadcast %cst_23 : f32 to vector<3x128xf32>
      %53 = arith.addf %52, %51 : vector<3x128xf32>
      %54 = arith.divf %52, %53 : vector<3x128xf32>
      %55 = arith.mulf %44, %54 : vector<3x128xf32>
      %c0_24 = arith.constant 0 : index
      %c0_25 = arith.constant 0 : index
      %56 = vector.load %arg9[%c0_24, %c0_25] : memref<128x1xf32, #tpu.memory_space<vmem>>, vector<128x1xf32>
      %cst_26 = arith.constant dense<0.000000e+00> : vector<3x1xf32>
      %57 = tpu.matmul %55, %56, %cst_26 {dimension_numbers = #tpu.dot_dimension_numbers<[1], [0], [0], [1], [0, 0, 1, 1], [], []>} : vector<3x128xf32>, vector<128x1xf32>, vector<3x1xf32> -> vector<3x1xf32>
      %c0_27 = arith.constant 0 : index
      %c0_28 = arith.constant 0 : index
      %58 = vector.load %arg10[%c0_27, %c0_28] : memref<1x1xf32, #tpu.memory_space<vmem>>, vector<1x1xf32>
      %59 = vector.broadcast %58 : vector<1x1xf32> to vector<3x1xf32>
      %60 = arith.addf %57, %59 : vector<3x1xf32>
      %cst_29 = arith.constant dense<0xFF800000> : vector<1xf32>
      %61 = vector.multi_reduction <maximumf>, %60, %cst_29 [0] : vector<3x1xf32> to vector<1xf32>
      %62 = vector.shape_cast %61 : vector<1xf32> to vector<1x1xf32>
      %63 = vector.broadcast %62 : vector<1x1xf32> to vector<3x1xf32>
      %64 = arith.subf %60, %63 : vector<3x1xf32>
      %65 = math.exp %64 : vector<3x1xf32>
      %cst_30 = arith.constant dense<0.000000e+00> : vector<1xf32>
      %66 = vector.multi_reduction <add>, %65, %cst_30 [0] : vector<3x1xf32> to vector<1xf32>
      %67 = vector.shape_cast %66 : vector<1xf32> to vector<1x1xf32>
      %68 = tpu.reciprocal %67 {approx = true} : vector<1x1xf32> -> vector<1x1xf32>
      %69 = vector.broadcast %68 : vector<1x1xf32> to vector<3x1xf32>
      %70 = arith.mulf %65, %69 : vector<3x1xf32>
      %cst_31 = arith.constant 1.000000e+00 : f32
      %71 = vector.broadcast %cst_31 : f32 to vector<3x1xf32>
      %72 = arith.addf %71, %70 : vector<3x1xf32>
      %73 = vector.broadcast %72 : vector<3x1xf32> to vector<3x64xf32>
      %74 = arith.mulf %73, %38 : vector<3x64xf32>
      %cst_32 = arith.constant dense<0.000000e+00> : vector<64xf32>
      %75 = vector.multi_reduction <add>, %74, %cst_32 [0] : vector<3x64xf32> to vector<64xf32>
      %76 = vector.shape_cast %75 : vector<64xf32> to vector<1x64xf32>
      %c0_33 = arith.constant 0 : index
      %c0_34 = arith.constant 0 : index
      %77 = vector.load %arg11[%c0_33, %c0_34] : memref<64x2xf32, #tpu.memory_space<vmem>>, vector<64x2xf32>
      %cst_35 = arith.constant dense<0.000000e+00> : vector<1x2xf32>
      %78 = tpu.matmul %76, %77, %cst_35 {dimension_numbers = #tpu.dot_dimension_numbers<[1], [0], [0], [1], [0, 0, 1, 1], [], []>} : vector<1x64xf32>, vector<64x2xf32>, vector<1x2xf32> -> vector<1x2xf32>
      %c0_36 = arith.constant 0 : index
      %c0_37 = arith.constant 0 : index
      %79 = vector.load %arg12[%c0_36, %c0_37] : memref<1x2xf32, #tpu.memory_space<vmem>>, vector<1x2xf32>
      %80 = arith.addf %78, %79 : vector<1x2xf32>
      %c0_38 = arith.constant 0 : index
      %c0_39 = arith.constant 0 : index
      %c0_40 = arith.constant 0 : index
      %81 = vector.load %arg13[%c0_38, %c0_39, %c0_40] : memref<1x1x2xf32, #tpu.memory_space<vmem>>, vector<1x1x2xf32>
      %82 = vector.shape_cast %81 : vector<1x1x2xf32> to vector<1x2xf32>
      %83 = vector.shape_cast %80 : vector<1x2xf32> to vector<1x1x2xf32>
      tpu.vector_store %arg13[%c0_38, %c0_39, %c0_40], %83 {strides = array<i32>} : memref<1x1x2xf32, #tpu.memory_space<vmem>>, vector<1x1x2xf32>,
    } else {
    }
    return
  }
  func.func @transform_0(%arg0: i32, %arg1: i32) -> (i32, i32, i32, i32) {
    %c0_i32 = arith.constant 0 : i32
    %c0_i32_0 = arith.constant 0 : i32
    %c0_i32_1 = arith.constant 0 : i32
    return %arg0, %arg1, %c0_i32, %c0_i32_0 : i32, i32, i32, i32
  }
  func.func @transform_1(%arg0: i32, %arg1: i32) -> (i32, i32) {
    %c0_i32 = arith.constant 0 : i32
    %c0_i32_0 = arith.constant 0 : i32
    %c0_i32_1 = arith.constant 0 : i32
    return %c0_i32, %c0_i32_0 : i32, i32
  }
  func.func @transform_2(%arg0: i32, %arg1: i32) -> (i32, i32) {
    %c0_i32 = arith.constant 0 : i32
    %c0_i32_0 = arith.constant 0 : i32
    %c0_i32_1 = arith.constant 0 : i32
    return %c0_i32, %c0_i32_0 : i32, i32
  }
  func.func @transform_3(%arg0: i32, %arg1: i32) -> (i32, i32) {
    %c0_i32 = arith.constant 0 : i32
    %c0_i32_0 = arith.constant 0 : i32
    %c0_i32_1 = arith.constant 0 : i32
    return %c0_i32, %c0_i32_0 : i32, i32
  }
  func.func @transform_4(%arg0: i32, %arg1: i32) -> (i32, i32) {
    %c0_i32 = arith.constant 0 : i32
    %c0_i32_0 = arith.constant 0 : i32
    %c0_i32_1 = arith.constant 0 : i32
    return %c0_i32, %c0_i32_0 : i32, i32
  }
  func.func @transform_5(%arg0: i32, %arg1: i32) -> (i32, i32) {
    %c0_i32 = arith.constant 0 : i32
    %c0_i32_0 = arith.constant 0 : i32
    %c0_i32_1 = arith.constant 0 : i32
    return %c0_i32, %c0_i32_0 : i32, i32
  }
  func.func @transform_6(%arg0: i32, %arg1: i32) -> (i32, i32) {
    %c0_i32 = arith.constant 0 : i32
    %c0_i32_0 = arith.constant 0 : i32
    %c0_i32_1 = arith.constant 0 : i32
    return %c0_i32, %c0_i32_0 : i32, i32
  }
  func.func @transform_7(%arg0: i32, %arg1: i32) -> (i32, i32) {
    %c0_i32 = arith.constant 0 : i32
    %c0_i32_0 = arith.constant 0 : i32
    %c0_i32_1 = arith.constant 0 : i32
    return %c0_i32, %c0_i32_0 : i32, i32
  }
  func.func @transform_8(%arg0: i32, %arg1: i32) -> (i32, i32) {
    %c0_i32 = arith.constant 0 : i32
    %c0_i32_0 = arith.constant 0 : i32
    %c0_i32_1 = arith.constant 0 : i32
    return %c0_i32, %c0_i32_0 : i32, i32
  }
  func.func @transform_9(%arg0: i32, %arg1: i32) -> (i32, i32) {
    %c0_i32 = arith.constant 0 : i32
    %c0_i32_0 = arith.constant 0 : i32
    %c0_i32_1 = arith.constant 0 : i32
    return %c0_i32, %c0_i32_0 : i32, i32
  }
  func.func @transform_10(%arg0: i32, %arg1: i32) -> (i32, i32) {
    %c0_i32 = arith.constant 0 : i32
    %c0_i32_0 = arith.constant 0 : i32
    %c0_i32_1 = arith.constant 0 : i32
    return %c0_i32, %c0_i32_0 : i32, i32
  }
  func.func @transform_11(%arg0: i32, %arg1: i32) -> (i32, i32, i32) {
    %c0_i32 = arith.constant 0 : i32
    %c0_i32_0 = arith.constant 0 : i32
    %c0_i32_1 = arith.constant 0 : i32
    return %arg0, %c0_i32, %c0_i32_0 : i32, i32, i32
  }
}

</mosaic_0001>

<bundles_post_ra>
// kernel: attention_mil_forward.1
= control target key start
LH: loop header
LB: loop body
LE: loop exit
PB: predicated region body
PF: predicated region fallthrough
CT: control target
= control target key end

     0   :  { %s1492_s19 = smov 0   ;;  %s1494_s20 = smov 0   ;;  %s1789_s0 = inlined_call_operand.vmem [shape: f32[2,3,3,256], index: 0, kind: input, shape index: {}]   ;;  %s1790_s1 = inlined_call_operand.vmem [shape: f32[32,3], index: 1, kind: input, shape index: {}]   ;;  %s1791_s2 = inlined_call_operand.vmem [shape: f32[32,1], index: 2, kind: input, shape index: {}]   ;;  %s1792_s3 = inlined_call_operand.vmem [shape: f32[64,128], index: 3, kind: input, shape index: {}]   ;;  %s1793_s4 = inlined_call_operand.vmem [shape: f32[1,128], index: 4, kind: input, shape index: {}]   ;;  %s1794_s5 = inlined_call_operand.vmem [shape: f32[64,128], index: 5, kind: input, shape index: {}]   ;;  %s1795_s6 = inlined_call_operand.vmem [shape: f32[1,128], index: 6, kind: input, shape index: {}]   ;;  %s1796_s7 = inlined_call_operand.vmem [shape: f32[128,1], index: 7, kind: input, shape index: {}]   ;;  %s1797_s8 = inlined_call_operand.<no memory space> [shape: f32[1,1], index: 8, kind: input, shape index: {}]   ;;  %s1798_s9 = inlined_call_operand.vmem [shape: f32[64,2], index: 9, kind: input, shape index: {}]   ;;  %s1799_s10 = inlined_call_operand.vmem [shape: f32[1,2], index: 10, kind: input, shape index: {}]   ;;  %s1800_s11 = inlined_call_operand.vmem [shape: f32[2,1,2], index: 11, kind: output, shape index: {}]  }
   0x1   :  { %v16_v0 = vstv %s1797_s8  ;;  %s1496_s21 = smov 0   ;;  %s1498_s22 = smov 0  }
   0x2   :  { %17 = vst [vmem:[#allocation3] sm:$0x1] %v16_v0  ;;  %s1500_s23 = smov 0  }
   0x3 LB: > { %s32_s8 = sadd.s32 1, %s1413_s21  ;;  %s35_s24 = sadd.s32 1, %s1417_s22  ;;  %s1421_s23 = sphi %s1500_s23, %s23_s23   ;;  %s1417_s22 = sphi %s1498_s22, %s1804_s22   ;;  %s1413_s21 = sphi %s1496_s21, %s1803_s21   ;;  %s1409_s20 = sphi %s1494_s20, %s1802_s20   ;;  %s1405_s19 = sphi %s1492_s19, %s1801_s19  }
   0x4   : > { %p33_p0 = scmp.ge.s32.totalorder %s32_s8, 3  ;;  %p1171_p1 = scmp.ge.s32.totalorder %s1421_s23, 1 }
   0x5   : > { %p357_p2 = scmp.lt.s32.totalorder %s1421_s23, 7 }
   0x6   : > { %s1806_s8 = smov (%p33_p0, %s32_s8), 0  ;;  %s1808_s24 = smov (!%p33_p0, %s35_s24), %s1417_s22 }
   0x7   : > { %p358_p3 = pnand %p1171_p1, %p357_p2  ;;  %p37_p4 = scmp.ge.s32.totalorder %s1808_s24, 2 }
   0x8   : > { %p399_p5 = scmp.lt.s32.totalorder (!%p358_p3), %s1409_s20, 1  ;;  %p401_p6 = scmp.lt.s32.totalorder (!%p358_p3), %s1405_s19, 2 }
   0x9   : > { %s1810_s24 = smov (%p37_p4, %s1808_s24), 0  ;;  %361 = sbr.rel (%p358_p3) target bundleno = 1169 (0x491), region = 64 }
   0xa   : > { %s647_s27 = scalar_lea.vmem (!%p358_p3), [#allocation2], %s1405_s19  ;;  %p1174_p7 = scmp.ne.s32.totalorder (!%p358_p3), %s1405_s19, 2 }
   0xe   : > { %v412_v1 = vld [vmem:[%s1790_s1] sm:$0xff]  ;;  %v1423_v2 = vmov 2   ;;  %v1424_v3 = vmov 1   ;;  %v415_v4 = vld [vmem:[%s1790_s1 + $0x18] sm:$0xff]  ;;  %v413_v5 = vld [vmem:[%s1790_s1 + $0x8] sm:$0xff]  ;;  %s1812_s20 = smov (!%p399_p5, %s1409_s20), 1  ;;  %v437_v12 = vlaneseq }
   0xf   : > { %1368 = vset.pattern.permute.xlu0 %v1423_v2  ;;  %1367 = vset.pattern.permute.xlu1 %v1424_v3  ;;  %s410_s14 = scalar_lea.vmem %s1800_s11, %s1812_s20  ;;  %v414_v6 = vld [vmem:[%s1790_s1 + $0x10] sm:$0xff]  ;;  %v1425_v7 = vmov 0   ;;  %v564_v8 = vld [vmem:[%s1791_s2 + $0x8] sm:$0xff]  ;;  %v563_v9 = vld [vmem:[%s1791_s2] sm:$0xff]  ;;  %s1320_s13 = smul.u32 6, %s1812_s20  ;;  %vm630_vm0 = vcmask 130112  }
  0x10   : > { %514 = vperm.xlu0 %1368, %v412_v1   ;;  %464 = vperm.xlu1 %1367, %v412_v1   ;;  %v565_v10 = vld [vmem:[%s1791_s2 + $0x10] sm:$0xff]  ;;  %v566_v11 = vld [vmem:[%s1791_s2 + $0x18] sm:$0xff]  ;;  %s402_s12 = scalar_select %p401_p6, %s1405_s19, 2  ;;  %v1558_v15 = vshrl.u32 %v437_v12, 7  ;;  %vm681_vm1 = vcmask 392512   ;;  %vm637_vm2 = vcmask 195712  }
  0x11   : > { %vm688_vm3 = vcmask 458112   ;;  %vm644_vm4 = vcmask 261312   ;;  %vm695_vm5 = vcmask 523712   ;;  %vm648_vm6 = vcmask 253952  }
  0x12   : > { %s1172_s15 = sshll.u32 %s402_s12, 1  ;;  %v439_v18 = vsub.s32 0, %v1558_v15  ;;  %v443_v19 = vsub.s32 4, %v1558_v15  ;;  %v481_v20 = vsub.s32 1, %v1558_v15  ;;  %v485_v21 = vsub.s32 5, %v1558_v15 }
  0x13   : > { %s405_s16 = sadd.s32 %s1320_s13, %s1172_s15  ;;  %v531_v27 = vsub.s32 2, %v1558_v15  ;;  %v535_v28 = vsub.s32 6, %v1558_v15  ;;  %vm698_vm7 = vcmask 516352  }
  0x14   : > { %526 = vperm.xlu0 %1368, %v415_v4   ;;  %468 = vperm.xlu1 %1367, %v413_v5   ;;  %s1173_s17 = sshll.u32 %s405_s16, 2 }
  0x15   : > { %s407_s26 = scalar_lea.vmem %s1789_s0, %s1173_s17 }
  0x16   : > { %v411_v22 = vld [vmem:[%s407_s26] sm:$0x77] }
  0x17   : > { %v440_v25 = vrot.slane %v411_v22, %v439_v18  ;;  %v444_v26 = vrot.slane %v411_v22, %v443_v19  ;;  %v482_v29 = vrot.slane %v411_v22, %v481_v20  ;;  %v486_v30 = vrot.slane %v411_v22, %v485_v21 }
  0x18   : > { %1370 = vset.pattern.permute.xlu0 %v1425_v7  ;;  %472 = vperm.xlu1 %1367, %v414_v6   ;;  %v532_v35 = vrot.slane %v411_v22, %v531_v27  ;;  %v536_v36 = vrot.slane %v411_v22, %v535_v28 }
  0x19   : > { %418 = vperm.xlu0 %1370, %v412_v1   ;;  %v450_v32 = vrot.slane %v440_v25, %v439_v18  ;;  %v454_v33 = vrot.slane %v444_v26, %v439_v18  ;;  %v492_v37 = vrot.slane %v482_v29, %v481_v20  ;;  %v496_v38 = vrot.slane %v486_v30, %v481_v20 }
  0x1a   : > { %v542_v43 = vrot.slane %v532_v35, %v531_v27  ;;  %v546_v44 = vrot.slane %v536_v36, %v531_v27 }
  0x1c   : > { %476 = vperm.xlu1 %1367, %v415_v4  }
  0x1d   : > { %423 = vperm.xlu0 %1370, %v413_v5  }
  0x20   : > { %1369 = vset.pattern.permute.xlu1 %v1423_v2 }
  0x21   : > { %428 = vperm.xlu0 %1370, %v414_v6   ;;  %518 = vperm.xlu1 %1369, %v413_v5  }
  0x25   : > { %433 = vperm.xlu0 %1370, %v415_v4   ;;  %522 = vperm.xlu1 %1369, %v414_v6  }
  0x29   : > { %574 = vperm.xlu0 %1370, %v564_v8   ;;  %1371 = vset.pattern.permute.xlu1 %v1425_v7 }
  0x2a   : > { %569 = vperm.xlu1 %1371, %v563_v9  }
  0x2e   : > { %579 = vperm.xlu1 %1371, %v565_v10  }
  0x32   : > { %584 = vperm.xlu1 %1371, %v566_v11  }
  0x8b   : > { %v465_v13 = vpop.permute.xlu1 %464  ;;  %v515_v14 = vpop.permute.xlu0 %514 }
  0x8c   : > { %v497_v47 = vmul.f32 %v492_v37, %v465_v13  ;;  %v498_v48 = vmul.f32 %v496_v38, %v465_v13  ;;  %v547_v57 = vmul.f32 %v542_v43, %v515_v14  ;;  %v548_v58 = vmul.f32 %v546_v44, %v515_v14 }
  0x8f   : > { %v469_v16 = vpop.permute.xlu1 %468  ;;  %v1560_v17 = vpop.permute.xlu0 %526 }
  0x90   : > { %v499_v49 = vmul.f32 %v492_v37, %v469_v16  ;;  %v500_v50 = vmul.f32 %v496_v38, %v469_v16  ;;  %v553_v30 = vmul.f32 %v542_v43, %v1560_v17 }
  0x93   : > { %v473_v23 = vpop.permute.xlu1 %472 }
  0x94   : > { %v419_v24 = vpop.permute.xlu0 %418  ;;  %v501_v61 = vmul.f32 %v492_v37, %v473_v23  ;;  %v502_v62 = vmul.f32 %v496_v38, %v473_v23 }
  0x95   : > { %v455_v39 = vmul.f32 %v450_v32, %v419_v24  ;;  %v456_v40 = vmul.f32 %v454_v33, %v419_v24 }
  0x97   : > { %v477_v31 = vpop.permute.xlu1 %476  ;;  %v505_v53 = vadd.f32 %v497_v47, %v455_v39  ;;  %v506_v54 = vadd.f32 %v498_v48, %v456_v40 }
  0x98   : > { %v424_v34 = vpop.permute.xlu0 %423  ;;  %v503_v10 = vmul.f32 %v492_v37, %v477_v31  ;;  %v504_v11 = vmul.f32 %v496_v38, %v477_v31  ;;  %v554_v31 = vmul.f32 %v546_v44, %v1560_v17 }
  0x99   : > { %v457_v45 = vmul.f32 %v450_v32, %v424_v34  ;;  %v458_v46 = vmul.f32 %v454_v33, %v424_v34  ;;  %v555_v8 = vadd.f32 %v547_v57, %v505_v53  ;;  %v556_v9 = vadd.f32 %v548_v58, %v506_v54 }
  0x9a   : > { %v620_v53 = vand.u32 127, %v437_v12 }
  0x9b   : > { %v507_v59 = vadd.f32 %v499_v49, %v457_v45  ;;  %v508_v60 = vadd.f32 %v500_v50, %v458_v46 }
  0x9c   : > { %v429_v41 = vpop.permute.xlu0 %428  ;;  %v519_v42 = vpop.permute.xlu1 %518  ;;  %v625_v57 = vadd.s32 4294967288, %v620_v53  ;;  %v671_v58 = vadd.s32 4294967264, %v620_v53 }
  0x9d   : > { %v549_v51 = vmul.f32 %v542_v43, %v519_v42  ;;  %v550_v52 = vmul.f32 %v546_v44, %v519_v42  ;;  %v459_v63 = vmul.f32 %v450_v32, %v429_v41  ;;  %v460_v0 = vmul.f32 %v454_v33, %v429_v41 }
  0x9f   : > { %v557_v3 = vadd.f32 %v549_v51, %v507_v59  ;;  %v558_v4 = vadd.f32 %v550_v52, %v508_v60  ;;  %v509_v18 = vadd.f32 %v501_v61, %v459_v63  ;;  %v510_v19 = vadd.f32 %v502_v62, %v460_v0 }
  0xa0   : > { %v434_v55 = vpop.permute.xlu0 %433  ;;  %v523_v56 = vpop.permute.xlu1 %522  ;;  %v632_v59 = vadd.s32 4294967280, %v620_v53  ;;  %v683_v60 = vadd.s32 4294967248, %v620_v53  ;;  %v690_v61 = vadd.s32 4294967240, %v620_v53 }
  0xa1   : > { %v461_v1 = vmul.f32 %v450_v32, %v434_v55  ;;  %v462_v2 = vmul.f32 %v454_v33, %v434_v55  ;;  %v551_v5 = vmul.f32 %v542_v43, %v523_v56  ;;  %v552_v6 = vmul.f32 %v546_v44, %v523_v56 }
  0xa2   : > { %v676_v56 = vadd.s32 4294967256, %v620_v53  ;;  %v635_v12 = vsub.s32 %v632_v59, %v1558_v15 }
  0xa3   : > { %v511_v22 = vadd.f32 %v503_v10, %v461_v1  ;;  %v512_v23 = vadd.f32 %v504_v11, %v462_v2  ;;  %v559_v28 = vadd.f32 %v551_v5, %v509_v18  ;;  %v560_v29 = vadd.f32 %v552_v6, %v510_v19 }
  0xa4   : > { %v575_v7 = vpop.permute.xlu0 %574  ;;  %v679_v63 = vsub.s32 %v676_v56, %v1558_v15  ;;  %v628_v1 = vsub.s32 %v625_v57, %v1558_v15  ;;  %v639_v2 = vadd.s32 4294967272, %v620_v53  ;;  %v686_v6 = vsub.s32 %v683_v60, %v1558_v15 }
  0xa5   : > { %v589_v13 = vadd.f32 %v575_v7, %v557_v3  ;;  %v590_v16 = vadd.f32 %v575_v7, %v558_v4  ;;  %v570_v14 = vpop.permute.xlu1 %569  ;;  %v561_v39 = vadd.f32 %v553_v30, %v511_v22  ;;  %v562_v40 = vadd.f32 %v554_v31, %v512_v23 }
  0xa6   : > { %v587_v20 = vadd.f32 %v570_v14, %v555_v8  ;;  %v588_v21 = vadd.f32 %v570_v14, %v556_v9  ;;  %v674_v4 = vsub.s32 %v671_v58, %v1558_v15  ;;  %v623_v8 = vsub.s32 %v620_v53, %v1558_v15 }
  0xa7   : > { %v597_v24 = vmax.f32 %v589_v13, 0.0  ;;  %v598_v25 = vmax.f32 %v590_v16, 0.0  ;;  %v693_v9 = vsub.s32 %v690_v61, %v1558_v15  ;;  %v642_v16 = vsub.s32 %v639_v2, %v1558_v15 }
  0xa8   : > { %v595_v26 = vmax.f32 %v587_v20, 0.0  ;;  %v596_v27 = vmax.f32 %v588_v21, 0.0 }
  0xa9   : > { %v580_v32 = vpop.permute.xlu1 %579  ;;  %v653_v33 = vadd.f32 %v598_v25, %v597_v24  ;;  %v606_v17 = vmax.f32 %v597_v24, %v598_v25 }
  0xaa   : > { %v591_v34 = vadd.f32 %v580_v32, %v559_v28  ;;  %v592_v35 = vadd.f32 %v580_v32, %v560_v29  ;;  %v650_v36 = vadd.f32 %v596_v27, %v595_v26  ;;  %v603_v47 = vmax.f32 %v595_v26, %v596_v27 }
  0xab   : > { %654 = vadd.xlane.f32.xlu1 %v653_v33 }
  0xac   : > { %v599_v37 = vmax.f32 %v591_v34, 0.0  ;;  %v600_v38 = vmax.f32 %v592_v35, 0.0  ;;  %651 = vadd.xlane.f32.xlu0 %v650_v36 }
  0xad   : > { %v585_v41 = vpop.permute.xlu1 %584 }
  0xae   : > { %v593_v42 = vadd.f32 %v585_v41, %v561_v39  ;;  %v594_v45 = vadd.f32 %v585_v41, %v562_v40  ;;  %v656_v46 = vadd.f32 %v600_v38, %v599_v37  ;;  %v609_v44 = vmax.f32 %v599_v37, %v600_v38 }
  0xb0   : > { %v601_v48 = vmax.f32 %v593_v42, 0.0  ;;  %v602_v43 = vmax.f32 %v594_v45, 0.0  ;;  %657 = vadd.xlane.f32.xlu1 %v656_v46  ;;  %604 = vmax.xlane.f32.xlu0 %v603_v47 }
  0xb2   : > { %v659_v49 = vadd.f32 %v602_v43, %v601_v48  ;;  %v612_v50 = vmax.f32 %v601_v48, %v602_v43 }
  0xb4   : > { %660 = vadd.xlane.f32.xlu1 %v659_v49  ;;  %607 = vmax.xlane.f32.xlu0 %v606_v17 }
  0xb8   : > { %610 = vmax.xlane.f32.xlu0 %v609_v44 }
  0xbc   : > { %613 = vmax.xlane.f32.xlu0 %v612_v50 }
 0x134   : > { %v655_v51 = vpop.xlane.xlu1 %654 }
 0x135   : > { %v652_v52 = vpop.xlane.xlu0 %651  ;;  %v664_v3 = vmul.f32 0.00390625, %v655_v51 }
 0x136   : > { %v663_v5 = vmul.f32 0.00390625, %v652_v52 }
 0x137   : > { %v680_v14 = vrot.slane %v664_v3, %v679_v63 }
 0x138   : > { %v675_v18 = vrot.slane %v663_v5, %v674_v4 }
 0x139   : > { %v658_v54 = vpop.xlane.xlu1 %657  ;;  %v605_v55 = vpop.xlane.xlu0 %604 }
 0x13a   : > { %v665_v7 = vmul.f32 0.00390625, %v658_v54  ;;  %v624_v21 = vrot.slane %v605_v55, %v623_v8  ;;  %v682_v26 = vsel %vm681_vm1, %v680_v14, %v675_v18 }
 0x13c   : > { %v687_v20 = vrot.slane %v665_v7, %v686_v6 }
 0x13d   : > { %v608_v62 = vpop.xlane.xlu0 %607  ;;  %v661_v0 = vpop.xlane.xlu1 %660 }
 0x13e   : > { %v666_v10 = vmul.f32 0.00390625, %v661_v0  ;;  %v629_v13 = vrot.slane %v608_v62, %v628_v1  ;;  %v689_v15 = vsel %vm688_vm3, %v687_v20, %v682_v26 }
 0x140   : > { %v694_v22 = vrot.slane %v666_v10, %v693_v9  ;;  %v631_v24 = vsel %vm630_vm0, %v629_v13, %v624_v21 }
 0x141   : > { %v611_v11 = vpop.xlane.xlu0 %610 }
 0x142   : > { %v636_v19 = vrot.slane %v611_v11, %v635_v12  ;;  %v696_v29 = vsel %vm695_vm5, %v694_v22, %v689_v15 }
 0x144   : > { %v638_v27 = vsel %vm637_vm2, %v636_v19, %v631_v24 }
 0x145   : > { %v614_v23 = vpop.xlane.xlu0 %613 }
 0x146   : > { %v643_v25 = vrot.slane %v614_v23, %v642_v16  ;;  %703 = sbr.rel (%p1174_p7) target bundleno = 1169 (0x491), region = 68 }
 0x148   : > { %v645_v28 = vsel %vm644_vm4, %v643_v25, %v638_v27 }
 0x149   : > { %649 = vst.msk [vmem:[%s647_s27] sm:$0x1] %vm648_vm6, %v645_v28 }
 0x14a   : > { %699 = vst.msk [vmem:[%s647_s27] sm:$0x1] %vm698_vm7, %v696_v29 }
 0x14b   : > { %v802_v30 = vld [vmem:[%s1794_s5 + $0x38] sm:$0xff]  ;;  %v1426_v32 = vmov 0.0   ;;  %v801_v33 = vld [vmem:[%s1794_s5 + $0x30] sm:$0xff]  ;;  %vm1427_vm8 = vmmov 0   ;;  %v800_v31 = vld [vmem:[%s1794_s5 + $0x28] sm:$0xff]  ;;  %vm720_vm9 = vcmask 523264  }
 0x14c   : > { %1247 = vmatprep.subr.mxu1 %v1426_v32  ;;  %1263 = vmatprep.mubr.msk.f32.mxu1 %vm1427_vm8, %v1426_v32  ;;  %v712_v34 = vld [vmem:[%s1792_s3 + $0x38] sm:$0xff]  ;;  %v711_v35 = vld [vmem:[%s1792_s3 + $0x30] sm:$0xff]  ;;  %v799_v36 = vld [vmem:[%s1794_s5 + $0x20] sm:$0xff]  ;;  %v1428_v13 = vmov 0   ;;  %vm980_vm10 = vcmask 2048   ;;  %vm1007_vm11 = vcmask 518144  }
 0x14d   : > { %1248 = vmatpush3.msra.mxu1 %v802_v30  ;;  %1228 = vmatprep.subr.mxu0 %v1426_v32  ;;  %v710_v37 = vld [vmem:[%s1792_s3 + $0x28] sm:$0xff]  ;;  %v798_v38 = vld [vmem:[%s1794_s5 + $0x18] sm:$0xff]  ;;  %v709_v39 = vld [vmem:[%s1792_s3 + $0x20] sm:$0xff]  ;;  %vm1097_vm12 = vcmask 8192  }
 0x14e   : > { %1249 = vmatprep.subr.mxu1 %v1426_v32  ;;  %1244 = vmatprep.mubr.msk.f32.mxu0 %vm1427_vm8, %v1426_v32  ;;  %v797_v40 = vld [vmem:[%s1794_s5 + $0x10] sm:$0xff]  ;;  %v708_v41 = vld [vmem:[%s1792_s3 + $0x18] sm:$0xff]  ;;  %v796_v42 = vld [vmem:[%s1794_s5 + $0x8] sm:$0xff] }
 0x14f   : > { %1250 = vmatpush3.msra.mxu1 %v801_v33  ;;  %1229 = vmatpush3.msra.mxu0 %v712_v34  ;;  %v707_v45 = vld [vmem:[%s1792_s3 + $0x10] sm:$0xff]  ;;  %v795_v46 = vld [vmem:[%s1794_s5] sm:$0xff]  ;;  %v706_v47 = vld [vmem:[%s1792_s3 + $0x8] sm:$0xff] }
 0x150   : > { %1251 = vmatprep.subr.mxu1 %v1426_v32  ;;  %1230 = vmatprep.subr.mxu0 %v1426_v32  ;;  %v705_v43 = vld [vmem:[%s1792_s3] sm:$0xff]  ;;  %v902_v49 = vld [vmem:[%s1796_s7 + $0x78] sm:$0xff]  ;;  %v901_v17 = vld [vmem:[%s1796_s7 + $0x70] sm:$0xff] }
 0x151   : > { %1252 = vmatpush3.msra.mxu1 %v800_v31  ;;  %1231 = vmatpush3.msra.mxu0 %v711_v35  ;;  %v1646_v48 = vld [vmem:[#allocation2] sm:$0x7]  ;;  %v900_v44 = vld [vmem:[%s1796_s7 + $0x68] sm:$0xff]  ;;  %v898_v51 = vld [vmem:[%s1796_s7 + $0x58] sm:$0xff] }
 0x152   : > { %1253 = vmatprep.subr.mxu1 %v1426_v32  ;;  %1232 = vmatprep.subr.mxu0 %v1426_v32  ;;  %v899_v50 = vld [vmem:[%s1796_s7 + $0x60] sm:$0xff]  ;;  %v897_v52 = vld [vmem:[%s1796_s7 + $0x50] sm:$0xff]  ;;  %v896_v53 = vld [vmem:[%s1796_s7 + $0x48] sm:$0xff] }
 0x153   : > { %1254 = vmatpush3.msra.mxu1 %v799_v36  ;;  %1233 = vmatpush3.msra.mxu0 %v710_v37  ;;  %v895_v54 = vld [vmem:[%s1796_s7 + $0x40] sm:$0xff]  ;;  %v894_v55 = vld [vmem:[%s1796_s7 + $0x38] sm:$0xff]  ;;  %v893_v56 = vld [vmem:[%s1796_s7 + $0x30] sm:$0xff] }
 0x154   : > { %1255 = vmatprep.subr.mxu1 %v1426_v32  ;;  %1234 = vmatprep.subr.mxu0 %v1426_v32  ;;  %v892_v57 = vld [vmem:[%s1796_s7 + $0x28] sm:$0xff]  ;;  %v891_v58 = vld [vmem:[%s1796_s7 + $0x20] sm:$0xff]  ;;  %v890_v59 = vld [vmem:[%s1796_s7 + $0x18] sm:$0xff] }
 0x155   : > { %1256 = vmatpush3.msra.mxu1 %v798_v38  ;;  %1235 = vmatpush3.msra.mxu0 %v709_v39  ;;  %v889_v60 = vld [vmem:[%s1796_s7 + $0x10] sm:$0xff]  ;;  %v888_v61 = vld [vmem:[%s1796_s7 + $0x8] sm:$0xff]  ;;  %v887_v62 = vld [vmem:[%s1796_s7] sm:$0xff] }
 0x156   : > { %1257 = vmatprep.subr.mxu1 %v1426_v32  ;;  %1236 = vmatprep.subr.mxu0 %v1426_v32  ;;  %v1177_v63 = vld [vmem:[%s1795_s6] ss:$0 sm:$0xff]  ;;  %v1180_v16 = vld [vmem:[#allocation3] ss:$0 sm:$0xff]  ;;  %v1022_v38 = vld [vmem:[%s1798_s9 + $0x38] sm:$0xff] }
 0x157   : > { %1258 = vmatpush3.msra.mxu1 %v797_v40  ;;  %1237 = vmatpush3.msra.mxu0 %v708_v41  ;;  %v1175_v12 = vld [vmem:[%s1793_s4] ss:$0 sm:$0xff]  ;;  %v1021_v40 = vld [vmem:[%s1798_s9 + $0x30] sm:$0xff] }
 0x158   : > { %1259 = vmatprep.subr.mxu1 %v1426_v32  ;;  %1238 = vmatprep.subr.mxu0 %v1426_v32 }
 0x159   : > { %1260 = vmatpush3.msra.mxu1 %v796_v42  ;;  %1239 = vmatpush3.msra.mxu0 %v707_v45  ;;  %v1020_v42 = vld [vmem:[%s1798_s9 + $0x28] sm:$0xff]  ;;  %v1019_v45 = vld [vmem:[%s1798_s9 + $0x20] sm:$0xff] }
 0x15a   : > { %1261 = vmatprep.subr.mxu1 %v1426_v32  ;;  %1240 = vmatprep.subr.mxu0 %v1426_v32 }
 0x15b   : > { %1262 = vmatpush3.msra.mxu1 %v795_v46  ;;  %1241 = vmatpush3.msra.mxu0 %v706_v47  ;;  %v1018_v46 = vld [vmem:[%s1798_s9 + $0x18] sm:$0xff]  ;;  %v1017_v47 = vld [vmem:[%s1798_s9 + $0x10] sm:$0xff] }
 0x15c   : > { %1264 = vmatmul.mubr.msk.f32.vlgmr.msra.gmra.mxu1 %vm720_vm9, %v1646_v48  ;;  %1242 = vmatprep.subr.mxu0 %v1426_v32 }
 0x15d   : > { %1243 = vmatpush3.msra.mxu0 %v705_v43  ;;  %1301 = vmatprep.subr.mxu1 %v1426_v32  ;;  %v1016_v43 = vld [vmem:[%s1798_s9 + $0x8] sm:$0xff] }
 0x15e   : > { %1245 = vmatmul.mubr.msk.f32.vlgmr.msra.gmra.mxu0 %vm720_vm9, %v1646_v48  ;;  %1266 = vmatprep.subr.mxu0 %v1426_v32 }
 0x15f   : > { %1298 = vmatprep.mubr.msk.f32.mxu0 %vm1427_vm8, %v1426_v32  ;;  %1317 = vmatprep.mubr.msk.f32.mxu1 %vm1427_vm8, %v1426_v32 }
 0x160   : > { %1267 = vmatpush3.msra.mxu0 %v902_v49  ;;  %1372 = vset.pattern.permute.xlu0 %v1428_v13  ;;  %v1015_v49 = vld [vmem:[%s1798_s9] sm:$0xff] }
 0x161   : > { %1268 = vmatprep.subr.mxu0 %v1426_v32  ;;  %1302 = vmatpush3.msra.mxu1 %v1022_v38 }
 0x162   : > { %1269 = vmatpush3.msra.mxu0 %v901_v17  ;;  %1303 = vmatprep.subr.mxu1 %v1426_v32 }
 0x163   : > { %1270 = vmatprep.subr.mxu0 %v1426_v32  ;;  %1304 = vmatpush3.msra.mxu1 %v1021_v40 }
 0x164   : > { %1271 = vmatpush3.msra.mxu0 %v900_v44  ;;  %1305 = vmatprep.subr.mxu1 %v1426_v32 }
 0x165   : > { %1272 = vmatprep.subr.mxu0 %v1426_v32  ;;  %1306 = vmatpush3.msra.mxu1 %v1020_v42 }
 0x166   : > { %1273 = vmatpush3.msra.mxu0 %v899_v50  ;;  %1307 = vmatprep.subr.mxu1 %v1426_v32 }
 0x167   : > { %1274 = vmatprep.subr.mxu0 %v1426_v32  ;;  %1308 = vmatpush3.msra.mxu1 %v1019_v45 }
 0x168   : > { %1275 = vmatpush3.msra.mxu0 %v898_v51  ;;  %1309 = vmatprep.subr.mxu1 %v1426_v32 }
 0x169   : > { %1276 = vmatprep.subr.mxu0 %v1426_v32  ;;  %1310 = vmatpush3.msra.mxu1 %v1018_v46 }
 0x16a   : > { %1277 = vmatpush3.msra.mxu0 %v897_v52  ;;  %1311 = vmatprep.subr.mxu1 %v1426_v32 }
 0x16b   : > { %1278 = vmatprep.subr.mxu0 %v1426_v32  ;;  %1312 = vmatpush3.msra.mxu1 %v1017_v47 }
 0x16c   : > { %1279 = vmatpush3.msra.mxu0 %v896_v53  ;;  %1313 = vmatprep.subr.mxu1 %v1426_v32 }
 0x16d   : > { %1280 = vmatprep.subr.mxu0 %v1426_v32  ;;  %1314 = vmatpush3.msra.mxu1 %v1016_v43 }
 0x16e   : > { %1281 = vmatpush3.msra.mxu0 %v895_v54  ;;  %1315 = vmatprep.subr.mxu1 %v1426_v32 }
 0x16f   : > { %1282 = vmatprep.subr.mxu0 %v1426_v32  ;;  %1316 = vmatpush3.msra.mxu1 %v1015_v49 }
 0x170   : > { %1283 = vmatpush3.msra.mxu0 %v894_v55 }
 0x171   : > { %1284 = vmatprep.subr.mxu0 %v1426_v32 }
 0x172   : > { %1285 = vmatpush3.msra.mxu0 %v893_v56 }
 0x173   : > { %1286 = vmatprep.subr.mxu0 %v1426_v32 }
 0x174   : > { %1287 = vmatpush3.msra.mxu0 %v892_v57 }
 0x175   : > { %1288 = vmatprep.subr.mxu0 %v1426_v32 }
 0x176   : > { %1289 = vmatpush3.msra.mxu0 %v891_v58 }
 0x177   : > { %1290 = vmatprep.subr.mxu0 %v1426_v32 }
 0x178   : > { %1291 = vmatpush3.msra.mxu0 %v890_v59 }
 0x179   : > { %1292 = vmatprep.subr.mxu0 %v1426_v32 }
 0x17a   : > { %1293 = vmatpush3.msra.mxu0 %v889_v60 }
 0x17b   : > { %1294 = vmatprep.subr.mxu0 %v1426_v32 }
 0x17c   : > { %1295 = vmatpush3.msra.mxu0 %v888_v61 }
 0x17d   : > { %1296 = vmatprep.subr.mxu0 %v1426_v32  ;;  %v1023_v32 = vld [vmem:[%s1799_s10] sm:$0x1] }
 0x17e   : > { %1297 = vmatpush3.msra.mxu0 %v887_v62 }
 0x21c   : > { %v876_v0 = vpop.f32.mrf.mxu1 }
 0x21d   : > { %v877_v1 = vadd.f32 %v1177_v63, %v876_v0 }
 0x21e   : > { %v1265_v2 = vpop.f32.mrf.mxu1  ;;  %v790_v3 = vpop.f32.mrf.mxu0 }
 0x21f   : > { %v1179_v4 = vmul.f32 -1.442695, %v877_v1  ;;  %v791_v6 = vadd.f32 %v1175_v12, %v790_v3 }
 0x220   : > { %v1246_v5 = vpop.f32.mrf.mxu0 }
 0x221   : > { %1373 = vpow2.f32 %v1179_v4 }
 0x222   : > { %1375 = vtanh.f32 %v791_v6 }
 0x22e   : > { %v1374_v7 = vpop.eup %1373 }
 0x22f   : > { %v883_v8 = vadd.f32 1.0, %v1374_v7  ;;  %v1376_v9 = vpop.eup %1375 }
 0x231   : > { %1377 = vrcp.f32 %v883_v8 }
 0x23e   : > { %v1378_v10 = vpop.eup %1377 }
 0x23f   : > { %v886_v11 = vmul.f32 %v1378_v10, %v1376_v9 }
 0x241   : > { %1299 = vmatmul.mubr.f32.vlgmr.msra.gmra.mxu0 %v886_v11 }
 0x301   : > { %v976_v14 = vpop.f32.mrf.mxu0 }
 0x302   : > { %v977_v18 = vadd.f32 %v1180_v16, %v976_v14 }
 0x303   : > { %v1300_v19 = vpop.f32.mrf.mxu0 }
 0x304   : > { %v981_v20 = vsel %vm980_vm10, %v977_v18, -inf }
 0x305   : > { %v982_v21 = vrot.slane %v981_v20, 4 }
 0x307   : > { %v983_v22 = vmax.f32 %v981_v20, %v982_v21 }
 0x309   : > { %v984_v23 = vrot.slane %v983_v22, 2 }
 0x30b   : > { %v985_v24 = vmax.f32 %v983_v22, %v984_v23 }
 0x30d   : > { %v986_v25 = vrot.slane %v985_v24, 1 }
 0x30f   : > { %v987_v26 = vmax.f32 %v985_v24, %v986_v25 }
 0x311   : > { %v988_v27 = vsub.f32 %v977_v18, %v987_v26 }
 0x313   : > { %v989_v15 = vmul.f32 1.442695, %v988_v27 }
 0x315   : > { %1379 = vpow2.f32 %v989_v15 }
 0x322   : > { %v1380_v28 = vpop.eup %1379 }
 0x323   : > { %v991_v29 = vsel %vm980_vm10, %v1380_v28, 0.0 }
 0x324   : > { %v992_v30 = vrot.slane %v991_v29, 4 }
 0x326   : > { %v993_v33 = vadd.f32 %v992_v30, %v991_v29 }
 0x328   : > { %v994_v31 = vrot.slane %v993_v33, 2 }
 0x32a   : > { %v995_v34 = vadd.f32 %v994_v31, %v993_v33 }
 0x32c   : > { %v996_v35 = vrot.slane %v995_v34, 1 }
 0x32e   : > { %v997_v36 = vadd.f32 %v996_v35, %v995_v34 }
 0x330   : > { %1381 = vrcp.f32 %v997_v36 }
 0x33d   : > { %v1382_v37 = vpop.eup %1381 }
 0x33e   : > { %v999_v39 = vmul.f32 %v1382_v37, %v1380_v28 }
 0x340   : > { %v1000_v41 = vadd.f32 1.0, %v999_v39 }
 0x342   : > { %1003 = vperm.xlu0 %1372, %v1000_v41  }
 0x3bd   : > { %v1004_v17 = vpop.permute.xlu0 %1003 }
 0x3be   : > { %v1006_v44 = vmul.f32 %v1004_v17, %v1646_v48 }
 0x3c0   : > { %v1008_v50 = vsel %vm1007_vm11, %v1006_v44, 0.0 }
 0x3c1   : > { %v1009_v51 = vrot.slane %v1008_v50, 4 }
 0x3c3   : > { %v1010_v52 = vadd.f32 %v1009_v51, %v1008_v50 }
 0x3c5   : > { %v1011_v53 = vrot.slane %v1010_v52, 2 }
 0x3c7   : > { %v1012_v54 = vadd.f32 %v1011_v53, %v1010_v52 }
 0x3c9   : > { %v1013_v55 = vrot.slane %v1012_v54, 1 }
 0x3cb   : > { %v1014_v56 = vadd.f32 %v1013_v55, %v1012_v54 }
 0x3cd   : > { %1318 = vmatmul.mubr.msk.f32.vlgmr.msra.gmra.mxu1 %vm720_vm9, %v1014_v56 }
 0x48d   : > { %v1093_v57 = vpop.f32.mrf.mxu1 }
 0x48e   : > { %v1094_v58 = vadd.f32 %v1093_v57, %v1023_v32 }
 0x48f   : > { %v1319_v59 = vpop.f32.mrf.mxu1 }
 0x490   : > { %1098 = vst.msk [vmem:[%s410_s14] sm:$0x1] %vm1097_vm12, %v1094_v58 }
 0x491 PF: > { %s23_s23 = sadd.s32 1, %s1421_s23   ;;  %s1801_s19 = smov %s1413_s21 }
 0x492   : > { %p20_p8 = scmp.ge.s32.totalorder %s23_s23, 8   ;;  %s1802_s20 = smov %s1417_s22 }
 0x493   : > { %s1803_s21 = smov %s1806_s8  ;;  %s1804_s22 = smov %s1810_s24 }
 0x494   :  { %22 = sbr.rel (!%p20_p8) target bundleno = 3 (0x3), region = 99 }

</bundles_post_ra>
